<compile_context>
chip_gen: v7x
topology: tpu7x:2x2x1
jax: 0.10.0
libtpu: 0.0.40
codegen_flags: <defaults>
</compile_context>

<pallas_src>
import functools

import jax
import jax.numpy as jnp
from jax.experimental import pallas as pl
from jax.experimental.pallas import tpu as pltpu


def _round_up(n, m):
    return ((n + m - 1) // m) * m


def _tpu_hw_info():
    """Best-effort (vmem_capacity_bytes, num_tensorcores); conservative fallback."""
    vmem_cap = 64 << 20  # fits every generation (v7x physical VMEM = 64 MiB)
    n_cores = 1
    try:
        info = pltpu.get_tpu_info()
        vmem_cap = int(getattr(info, "vmem_capacity_bytes", vmem_cap))
        for attr in ("num_tensorcores", "tensorcore_count", "num_cores", "core_count"):
            v = getattr(info, attr, None)
            if isinstance(v, int) and v > 0:
                n_cores = v
                break
    except Exception:
        pass
    return vmem_cap, n_cores


def _mlp_log_softmax_kernel(x_ref, w1_ref, b1_ref, w2_ref, b2_ref, o_ref, *,
                            n_valid_out):
    # x_ref:  (tm, D_in)        VMEM tile of flattened rows (native dtype)
    # w1_ref: (D_in, E)         full weight, resident (single-buffered)
    # b1_ref: (1, E)
    # w2_ref: (E, D_out_p)      lane-padded weight
    # b2_ref: (1, D_out_p)
    # o_ref:  (tm, D_out_p)     lane-dense output tile

    # Linear1 + ReLU: native-dtype tile straight into the MXU, f32 accumulation.
    h = jnp.dot(x_ref[...], w1_ref[...], preferred_element_type=jnp.float32)
    h = h + b1_ref[...].astype(jnp.float32)
    h = jnp.maximum(h, 0.0)

    # TODO(synk): dropout is p=0 in this module; training-mode dropout with
    # p>0 would need pltpu.prng_seed / pltpu.prng_random_bits here.

    # Linear2 — cast the hidden activation to the weight dtype so bf16 models
    # keep the bf16 MXU path (no-op for f32 models).
    logits = jnp.dot(h.astype(w2_ref.dtype), w2_ref[...],
                     preferred_element_type=jnp.float32)
    logits = logits + b2_ref[...].astype(jnp.float32)

    # Lane padding: force padded logit columns to a large negative so they
    # cannot affect the row max or the softmax denominator.
    if n_valid_out is not None:
        col = jax.lax.broadcasted_iota(jnp.int32, logits.shape, 1)
        logits = jnp.where(col < n_valid_out, logits, jnp.float32(-1e30))

    # Numerically-stable log-softmax along the last (lane) axis, all in f32
    # (reductions on the XLU, exp/log on the EUP); convert only at store.
    m = jnp.max(logits, axis=-1, keepdims=True)
    shifted = logits - m
    lse = jnp.log(jnp.sum(jnp.exp(shifted), axis=-1, keepdims=True))
    o_ref[...] = (shifted - lse).astype(o_ref.dtype)


@functools.partial(jax.jit, static_argnames=("tm", "single_buffer_weights"))
def _mlp_log_softmax_impl(x, w1, b1, w2, b2, *, tm, single_buffer_weights):
    B, S, D_in = x.shape
    E = w1.shape[1]
    D_out = w2.shape[1]
    M = B * S
    x2d = x.reshape(M, D_in)

    x_b = jnp.dtype(x.dtype).itemsize
    w_b = jnp.dtype(w1.dtype).itemsize
    sub = max(8, 32 // max(1, x_b))  # sublane packing: 8 f32 / 16 bf16 / 32 int8

    # Lane-dense output: pad W2/b2 columns to a multiple of 128 (padded logit
    # columns are masked in-kernel and sliced off after the call).
    D_out_p = _round_up(D_out, 128)
    if D_out_p != D_out:
        w2 = jnp.pad(w2, ((0, 0), (0, D_out_p - D_out)))
        b2 = jnp.pad(b2, ((0, D_out_p - D_out),))
        n_valid_out = D_out
    else:
        n_valid_out = None

    b1_2d = b1.reshape(1, E)
    b2_2d = b2.reshape(1, D_out_p)

    vmem_cap, n_cores = _tpu_hw_info()
    budget = int(vmem_cap * 0.75)  # headroom for compiler scratch / semaphores

    # Row tile: as large as possible; only force >=2 grid steps on
    # multi-TensorCore parts (v7x).  When the tile equals the full row count
    # the (8,128) constraint is trivially satisfied (block == full dim).
    if M <= tm:
        if n_cores >= 2 and M >= 2 * sub:
            tm_eff = _round_up(pl.cdiv(M, 2), sub)
        else:
            tm_eff = M
    else:
        tm_eff = _round_up(tm, sub)

    weight_buf = 1 if single_buffer_weights else 2
    weights_bytes = weight_buf * ((D_in * E + E) + (E * D_out_p + D_out_p)) * w_b

    def vmem_needed(t):
        return (weights_bytes
                + 2 * t * D_in * x_b         # double-buffered input tiles
                + 2 * t * D_out_p * x_b      # double-buffered output tiles
                + t * E * 4                  # f32 hidden intermediate
                + 2 * t * D_out_p * 4)       # f32 logits / log-softmax temps

    # Shrink the row tile if the VMEM footprint would blow the budget.
    while tm_eff > sub and vmem_needed(tm_eff) > budget:
        smaller = _round_up(max(sub, tm_eff // 2), sub)
        if smaller >= tm_eff:
            break
        tm_eff = smaller
    # TODO(synk): if the resident weights alone ever exceed the budget (very
    # large E / D_out on v7x's 64 MiB VMEM), add an E-chunked inner grid axis
    # with an f32 (tm, D_out_p) logits accumulator instead of full residency.

    vmem_limit = int(min(budget, max(2 * vmem_needed(tm_eff) + (4 << 20), 16 << 20)))

    # Partial final block (when tm_eff does not divide M) is handled by Pallas
    # boundary masking: overhang rows never mix with valid rows (row-wise op)
    # and their stores are dropped, so no wrapper-side pad copy is needed.
    grid = (pl.cdiv(M, tm_eff),)

    def weight_spec(shape):
        if single_buffer_weights:
            # Constant index_map: fetched once; no double-buffer reservation.
            return pl.BlockSpec(shape, lambda i: (0, 0),
                                pipeline_mode=pl.Buffered(1))
        return pl.BlockSpec(shape, lambda i: (0, 0))

    kernel = functools.partial(_mlp_log_softmax_kernel, n_valid_out=n_valid_out)

    out = pl.pallas_call(
        kernel,
        out_shape=jax.ShapeDtypeStruct((M, D_out_p), x.dtype),
        grid_spec=pltpu.PrefetchScalarGridSpec(
            num_scalar_prefetch=0,
            grid=grid,
            in_specs=[
                pl.BlockSpec((tm_eff, D_in), lambda i: (i, 0)),  # x row tile
                weight_spec((D_in, E)),                          # W1 (resident)
                weight_spec((1, E)),                             # b1
                weight_spec((E, D_out_p)),                       # W2 (resident)
                weight_spec((1, D_out_p)),                       # b2
            ],
            out_specs=pl.BlockSpec((tm_eff, D_out_p), lambda i: (i, 0)),
        ),
        compiler_params=pltpu.CompilerParams(
            dimension_semantics=("parallel",),
            vmem_limit_bytes=vmem_limit,
        ),
    )(x2d, w1, b1_2d, w2, b2_2d)

    return out[:, :D_out].reshape(B, S, D_out)


def mlp_log_softmax(x, w1, b1, w2, b2, *, tm=512):
    """x: (B, S, D_in) -> (B, S, D_out) with log-softmax over the last dim."""
    try:
        return _mlp_log_softmax_impl(x, w1, b1, w2, b2, tm=tm,
                                     single_buffer_weights=True)
    except Exception:
        # Fallback for JAX builds that reject pl.Buffered(1) single-buffering.
        return _mlp_log_softmax_impl(x, w1, b1, w2, b2, tm=tm,
                                     single_buffer_weights=False)


def init_params(key, input_size, embedding_size, output_size, dtype=jnp.float32):
    """Deterministic init matching the PyTorch module:
    - weights: xavier_uniform_ with gain = calculate_gain('relu') = sqrt(2)
    - biases:  PyTorch Linear default, U(-1/sqrt(fan_in), 1/sqrt(fan_in))
    Weights stored as (in_features, out_features)."""
    k1, k2, k3, k4 = jax.random.split(key, 4)
    gain = jnp.sqrt(2.0)

    def xavier(k, fan_in, fan_out):
        bound = gain * jnp.sqrt(6.0 / (fan_in + fan_out))
        return jax.random.uniform(k, (fan_in, fan_out), dtype, -bound, bound)

    def bias(k, fan_in, fan_out):
        bound = 1.0 / jnp.sqrt(fan_in)
        return jax.random.uniform(k, (fan_out,), dtype, -bound, bound)

    w1 = xavier(k1, input_size, embedding_size)
    b1 = bias(k2, input_size, embedding_size)
    w2 = xavier(k3, embedding_size, output_size)
    b2 = bias(k4, embedding_size, output_size)
    return w1, b1, w2, b2


if __name__ == "__main__":
    # Small shapes consistent with the module: (batch, seq, input_size)
    B, S = 2, 8
    input_size, embedding_size, output_size = 32, 64, 16

    key = jax.random.PRNGKey(0)
    kx, kp = jax.random.split(key)
    x = jax.random.normal(kx, (B, S, input_size), jnp.float32)
    w1, b1, w2, b2 = init_params(kp, input_size, embedding_size, output_size)

    y = mlp_log_softmax(x, w1, b1, w2, b2)
    jax.block_until_ready(y)

    # Sanity: pure-JAX reference check of the fused kernel.
    h_ref = jnp.maximum(x @ w1 + b1, 0.0)
    logits_ref = h_ref @ w2 + b2
    y_ref = jax.nn.log_softmax(logits_ref, axis=2)
    assert y.shape == (B, S, output_size)
    assert jnp.allclose(y, y_ref, atol=1e-5, rtol=1e-5)

    print("KERNEL_OK")
</pallas_src>

<mosaic_0001>
module attributes {stable_mosaic.version = 11 : i64} {
  func.func @_mlp_log_softmax_kernel(%arg0: i32, %arg1: memref<16x32xf32, #tpu.memory_space<vmem>>, %arg2: memref<32x64xf32, #tpu.memory_space<vmem>>, %arg3: memref<1x64xf32, #tpu.memory_space<vmem>>, %arg4: memref<64x128xf32, #tpu.memory_space<vmem>>, %arg5: memref<1x128xf32, #tpu.memory_space<vmem>>, %arg6: memref<16x128xf32, #tpu.memory_space<vmem>>) attributes {dimension_semantics = [#tpu.dimension_semantics<parallel>], iteration_bounds = array<i64: 1>, scalar_prefetch = 0 : i64, scratch_operands = 0 : i64, tpu.core_type = #tpu.core_type<tc>, window_params = [{transform_indices = @transform_0, window_bounds = array<i64: 16, 32>}, {pipeline_mode = #tpu.pipeline_mode<synchronous>, transform_indices = @transform_1, window_bounds = array<i64: 32, 64>}, {pipeline_mode = #tpu.pipeline_mode<synchronous>, transform_indices = @transform_2, window_bounds = array<i64: 1, 64>}, {pipeline_mode = #tpu.pipeline_mode<synchronous>, transform_indices = @transform_3, window_bounds = array<i64: 64, 128>}, {pipeline_mode = #tpu.pipeline_mode<synchronous>, transform_indices = @transform_4, window_bounds = array<i64: 1, 128>}, {transform_indices = @transform_5, window_bounds = array<i64: 16, 128>}]} {
    %c0 = arith.constant 0 : index
    %c0_0 = arith.constant 0 : index
    %0 = vector.load %arg1[%c0, %c0_0] : memref<16x32xf32, #tpu.memory_space<vmem>>, vector<16x32xf32>
    %c0_1 = arith.constant 0 : index
    %c0_2 = arith.constant 0 : index
    %1 = vector.load %arg2[%c0_1, %c0_2] : memref<32x64xf32, #tpu.memory_space<vmem>>, vector<32x64xf32>
    %cst = arith.constant dense<0.000000e+00> : vector<16x64xf32>
    %2 = tpu.matmul %0, %1, %cst {dimension_numbers = #tpu.dot_dimension_numbers<[1], [0], [0], [1], [0, 0, 1, 1], [], []>} : vector<16x32xf32>, vector<32x64xf32>, vector<16x64xf32> -> vector<16x64xf32>
    %c0_3 = arith.constant 0 : index
    %c0_4 = arith.constant 0 : index
    %3 = vector.load %arg3[%c0_3, %c0_4] : memref<1x64xf32, #tpu.memory_space<vmem>>, vector<1x64xf32>
    %4 = vector.broadcast %3 : vector<1x64xf32> to vector<16x64xf32>
    %5 = arith.addf %2, %4 : vector<16x64xf32>
    %cst_5 = arith.constant 0.000000e+00 : f32
    %6 = vector.broadcast %cst_5 : f32 to vector<16x64xf32>
    %7 = arith.maximumf %5, %6 : vector<16x64xf32>
    %c0_6 = arith.constant 0 : index
    %c0_7 = arith.constant 0 : index
    %8 = vector.load %arg4[%c0_6, %c0_7] : memref<64x128xf32, #tpu.memory_space<vmem>>, vector<64x128xf32>
    %cst_8 = arith.constant dense<0.000000e+00> : vector<16x128xf32>
    %9 = tpu.matmul %7, %8, %cst_8 {dimension_numbers = #tpu.dot_dimension_numbers<[1], [0], [0], [1], [0, 0, 1, 1], [], []>} : vector<16x64xf32>, vector<64x128xf32>, vector<16x128xf32> -> vector<16x128xf32>
    %c0_9 = arith.constant 0 : index
    %c0_10 = arith.constant 0 : index
    %10 = vector.load %arg5[%c0_9, %c0_10] : memref<1x128xf32, #tpu.memory_space<vmem>>, vector<1x128xf32>
    %11 = vector.broadcast %10 : vector<1x128xf32> to vector<16x128xf32>
    %12 = arith.addf %9, %11 : vector<16x128xf32>
    %13 = tpu.iota {dimensions = array<i32: 1>} : vector<16x128xi32>
    %c16_i32 = arith.constant 16 : i32
    %14 = vector.broadcast %c16_i32 : i32 to vector<16x128xi32>
    %15 = arith.cmpi slt, %13, %14 : vector<16x128xi32>
    %cst_11 = arith.constant -1.000000e+30 : f32
    %16 = vector.broadcast %cst_11 : f32 to vector<16x128xf32>
    %17 = arith.select %15, %12, %16 : vector<16x128xi1>, vector<16x128xf32>
    %cst_12 = arith.constant dense<0xFF800000> : vector<16xf32>
    %18 = vector.multi_reduction <maximumf>, %17, %cst_12 [1] : vector<16x128xf32> to vector<16xf32>
    %19 = vector.shape_cast %18 : vector<16xf32> to vector<16x1xf32>
    %20 = vector.broadcast %19 : vector<16x1xf32> to vector<16x128xf32>
    %21 = arith.subf %17, %20 : vector<16x128xf32>
    %22 = math.exp %21 : vector<16x128xf32>
    %cst_13 = arith.constant dense<0.000000e+00> : vector<16xf32>
    %23 = vector.multi_reduction <add>, %22, %cst_13 [1] : vector<16x128xf32> to vector<16xf32>
    %24 = vector.shape_cast %23 : vector<16xf32> to vector<16x1xf32>
    %25 = math.log %24 : vector<16x1xf32>
    %26 = vector.broadcast %25 : vector<16x1xf32> to vector<16x128xf32>
    %27 = arith.subf %21, %26 : vector<16x128xf32>
    %c0_14 = arith.constant 0 : index
    %c0_15 = arith.constant 0 : index
    %28 = vector.load %arg6[%c0_14, %c0_15] : memref<16x128xf32, #tpu.memory_space<vmem>>, vector<16x128xf32>
    tpu.vector_store %arg6[%c0_14, %c0_15], %27 {strides = array<i32>} : memref<16x128xf32, #tpu.memory_space<vmem>>, vector<16x128xf32>,
    return
  }
  func.func @transform_0(%arg0: i32) -> (i32, i32) {
    %c0_i32 = arith.constant 0 : i32
    %c0_i32_0 = arith.constant 0 : i32
    return %arg0, %c0_i32 : i32, i32
  }
  func.func @transform_1(%arg0: i32) -> (i32, i32) {
    %c0_i32 = arith.constant 0 : i32
    %c0_i32_0 = arith.constant 0 : i32
    %c0_i32_1 = arith.constant 0 : i32
    return %c0_i32, %c0_i32_0 : i32, i32
  }
  func.func @transform_2(%arg0: i32) -> (i32, i32) {
    %c0_i32 = arith.constant 0 : i32
    %c0_i32_0 = arith.constant 0 : i32
    %c0_i32_1 = arith.constant 0 : i32
    return %c0_i32, %c0_i32_0 : i32, i32
  }
  func.func @transform_3(%arg0: i32) -> (i32, i32) {
    %c0_i32 = arith.constant 0 : i32
    %c0_i32_0 = arith.constant 0 : i32
    %c0_i32_1 = arith.constant 0 : i32
    return %c0_i32, %c0_i32_0 : i32, i32
  }
  func.func @transform_4(%arg0: i32) -> (i32, i32) {
    %c0_i32 = arith.constant 0 : i32
    %c0_i32_0 = arith.constant 0 : i32
    %c0_i32_1 = arith.constant 0 : i32
    return %c0_i32, %c0_i32_0 : i32, i32
  }
  func.func @transform_5(%arg0: i32) -> (i32, i32) {
    %c0_i32 = arith.constant 0 : i32
    %c0_i32_0 = arith.constant 0 : i32
    return %arg0, %c0_i32 : i32, i32
  }
}

module attributes {stable_mosaic.version = 11 : i64} {
  func.func @_mlp_log_softmax_kernel(%arg0: i32, %arg1: memref<16x32xf32, #tpu.memory_space<vmem>>, %arg2: memref<32x64xf32, #tpu.memory_space<vmem>>, %arg3: memref<1x64xf32, #tpu.memory_space<vmem>>, %arg4: memref<64x128xf32, #tpu.memory_space<vmem>>, %arg5: memref<1x128xf32, #tpu.memory_space<vmem>>, %arg6: memref<16x128xf32, #tpu.memory_space<vmem>>) attributes {dimension_semantics = [#tpu.dimension_semantics<parallel>], iteration_bounds = array<i64: 1>, scalar_prefetch = 0 : i64, scratch_operands = 0 : i64, tpu.core_type = #tpu.core_type<tc>, window_params = [{transform_indices = @transform_0, window_bounds = array<i64: 16, 32>}, {pipeline_mode = #tpu.pipeline_mode<synchronous>, transform_indices = @transform_1, window_bounds = array<i64: 32, 64>}, {pipeline_mode = #tpu.pipeline_mode<synchronous>, transform_indices = @transform_2, window_bounds = array<i64: 1, 64>}, {pipeline_mode = #tpu.pipeline_mode<synchronous>, transform_indices = @transform_3, window_bounds = array<i64: 64, 128>}, {pipeline_mode = #tpu.pipeline_mode<synchronous>, transform_indices = @transform_4, window_bounds = array<i64: 1, 128>}, {transform_indices = @transform_5, window_bounds = array<i64: 16, 128>}]} {
    %c0 = arith.constant 0 : index
    %c0_0 = arith.constant 0 : index
    %0 = vector.load %arg1[%c0, %c0_0] : memref<16x32xf32, #tpu.memory_space<vmem>>, vector<16x32xf32>
    %c0_1 = arith.constant 0 : index
    %c0_2 = arith.constant 0 : index
    %1 = vector.load %arg2[%c0_1, %c0_2] : memref<32x64xf32, #tpu.memory_space<vmem>>, vector<32x64xf32>
    %cst = arith.constant dense<0.000000e+00> : vector<16x64xf32>
    %2 = tpu.matmul %0, %1, %cst {dimension_numbers = #tpu.dot_dimension_numbers<[1], [0], [0], [1], [0, 0, 1, 1], [], []>} : vector<16x32xf32>, vector<32x64xf32>, vector<16x64xf32> -> vector<16x64xf32>
    %c0_3 = arith.constant 0 : index
    %c0_4 = arith.constant 0 : index
    %3 = vector.load %arg3[%c0_3, %c0_4] : memref<1x64xf32, #tpu.memory_space<vmem>>, vector<1x64xf32>
    %4 = vector.broadcast %3 : vector<1x64xf32> to vector<16x64xf32>
    %5 = arith.addf %2, %4 : vector<16x64xf32>
    %cst_5 = arith.constant 0.000000e+00 : f32
    %6 = vector.broadcast %cst_5 : f32 to vector<16x64xf32>
    %7 = arith.maximumf %5, %6 : vector<16x64xf32>
    %c0_6 = arith.constant 0 : index
    %c0_7 = arith.constant 0 : index
    %8 = vector.load %arg4[%c0_6, %c0_7] : memref<64x128xf32, #tpu.memory_space<vmem>>, vector<64x128xf32>
    %cst_8 = arith.constant dense<0.000000e+00> : vector<16x128xf32>
    %9 = tpu.matmul %7, %8, %cst_8 {dimension_numbers = #tpu.dot_dimension_numbers<[1], [0], [0], [1], [0, 0, 1, 1], [], []>} : vector<16x64xf32>, vector<64x128xf32>, vector<16x128xf32> -> vector<16x128xf32>
    %c0_9 = arith.constant 0 : index
    %c0_10 = arith.constant 0 : index
    %10 = vector.load %arg5[%c0_9, %c0_10] : memref<1x128xf32, #tpu.memory_space<vmem>>, vector<1x128xf32>
    %11 = vector.broadcast %10 : vector<1x128xf32> to vector<16x128xf32>
    %12 = arith.addf %9, %11 : vector<16x128xf32>
    %13 = tpu.iota {dimensions = array<i32: 1>} : vector<16x128xi32>
    %c16_i32 = arith.constant 16 : i32
    %14 = vector.broadcast %c16_i32 : i32 to vector<16x128xi32>
    %15 = arith.cmpi slt, %13, %14 : vector<16x128xi32>
    %cst_11 = arith.constant -1.000000e+30 : f32
    %16 = vector.broadcast %cst_11 : f32 to vector<16x128xf32>
    %17 = arith.select %15, %12, %16 : vector<16x128xi1>, vector<16x128xf32>
    %cst_12 = arith.constant dense<0xFF800000> : vector<16xf32>
    %18 = vector.multi_reduction <maximumf>, %17, %cst_12 [1] : vector<16x128xf32> to vector<16xf32>
    %19 = vector.shape_cast %18 : vector<16xf32> to vector<16x1xf32>
    %20 = vector.broadcast %19 : vector<16x1xf32> to vector<16x128xf32>
    %21 = arith.subf %17, %20 : vector<16x128xf32>
    %22 = math.exp %21 : vector<16x128xf32>
    %cst_13 = arith.constant dense<0.000000e+00> : vector<16xf32>
    %23 = vector.multi_reduction <add>, %22, %cst_13 [1] : vector<16x128xf32> to vector<16xf32>
    %24 = vector.shape_cast %23 : vector<16xf32> to vector<16x1xf32>
    %25 = math.log %24 : vector<16x1xf32>
    %26 = vector.broadcast %25 : vector<16x1xf32> to vector<16x128xf32>
    %27 = arith.subf %21, %26 : vector<16x128xf32>
    %c0_14 = arith.constant 0 : index
    %c0_15 = arith.constant 0 : index
    %28 = vector.load %arg6[%c0_14, %c0_15] : memref<16x128xf32, #tpu.memory_space<vmem>>, vector<16x128xf32>
    tpu.vector_store %arg6[%c0_14, %c0_15], %27 {strides = array<i32>} : memref<16x128xf32, #tpu.memory_space<vmem>>, vector<16x128xf32>,
    return
  }
  func.func @transform_0(%arg0: i32) -> (i32, i32) {
    %c0_i32 = arith.constant 0 : i32
    %c0_i32_0 = arith.constant 0 : i32
    return %arg0, %c0_i32 : i32, i32
  }
  func.func @transform_1(%arg0: i32) -> (i32, i32) {
    %c0_i32 = arith.constant 0 : i32
    %c0_i32_0 = arith.constant 0 : i32
    %c0_i32_1 = arith.constant 0 : i32
    return %c0_i32, %c0_i32_0 : i32, i32
  }
  func.func @transform_2(%arg0: i32) -> (i32, i32) {
    %c0_i32 = arith.constant 0 : i32
    %c0_i32_0 = arith.constant 0 : i32
    %c0_i32_1 = arith.constant 0 : i32
    return %c0_i32, %c0_i32_0 : i32, i32
  }
  func.func @transform_3(%arg0: i32) -> (i32, i32) {
    %c0_i32 = arith.constant 0 : i32
    %c0_i32_0 = arith.constant 0 : i32
    %c0_i32_1 = arith.constant 0 : i32
    return %c0_i32, %c0_i32_0 : i32, i32
  }
  func.func @transform_4(%arg0: i32) -> (i32, i32) {
    %c0_i32 = arith.constant 0 : i32
    %c0_i32_0 = arith.constant 0 : i32
    %c0_i32_1 = arith.constant 0 : i32
    return %c0_i32, %c0_i32_0 : i32, i32
  }
  func.func @transform_5(%arg0: i32) -> (i32, i32) {
    %c0_i32 = arith.constant 0 : i32
    %c0_i32_0 = arith.constant 0 : i32
    return %arg0, %c0_i32 : i32, i32
  }
}

</mosaic_0001>

<bundles_post_ra>
// kernel: _mlp_log_softmax_impl.1
= control target key start
LH: loop header
LB: loop body
LE: loop exit
PB: predicated region body
PF: predicated region fallthrough
CT: control target
= control target key end

     0   :  { %vm33_vm0 = vcmask 261120   ;;  %vm132_vm1 = vcmask 523264   ;;  %v214_v27 = vlaneseq  ;;  %s415_s1 = inlined_call_operand.vmem [shape: f32[32,64], index: 1, kind: input, shape index: {}]   ;;  %s416_s0 = inlined_call_operand.vmem [shape: f32[16,32], index: 0, kind: input, shape index: {}]   ;;  %s417_s3 = inlined_call_operand.vmem [shape: f32[64,128], index: 3, kind: input, shape index: {}]   ;;  %s418_s2 = inlined_call_operand.vmem [shape: f32[1,64], index: 2, kind: input, shape index: {}]   ;;  %s419_s4 = inlined_call_operand.vmem [shape: f32[1,128], index: 4, kind: input, shape index: {}]   ;;  %s420_s5 = inlined_call_operand.vmem [shape: f32[16,128], index: 5, kind: output, shape index: {}]  }
   0x1   :  { %v22_v0 = vld [vmem:[%s415_s1] sm:$0xff]  ;;  %v23_v1 = vld [vmem:[%s415_s1 + $0x8] sm:$0xff]  ;;  %v24_v2 = vld [vmem:[%s415_s1 + $0x10] sm:$0xff] }
   0x2   :  { %v297_v3 = vpack.c.bf16 %v23_v1, %v22_v0  ;;  %v25_v4 = vld [vmem:[%s415_s1 + $0x18] sm:$0xff]  ;;  %v20_v5 = vld [vmem:[%s416_s0] sm:$0xff]  ;;  %v118_v8 = vld [vmem:[%s417_s3 + $0x8] sm:$0xff]  ;;  %v215_v28 = vand.u32 127, %v214_v27 }
   0x3   :  { %v301_v6 = vpack.c.bf16 %v25_v4, %v24_v2  ;;  %275 = vmatprep.mubr.msk.f32.mxu0 %vm33_vm0, %v20_v5  ;;  %v117_v7 = vld [vmem:[%s417_s3] sm:$0xff]  ;;  %v119_v9 = vld [vmem:[%s417_s3 + $0x10] sm:$0xff]  ;;  %v120_v11 = vld [vmem:[%s417_s3 + $0x18] sm:$0xff] }
   0x4   :  { %298 = vmatprep.subr.bf16.mxu0 %v297_v3  ;;  %v305_v10 = vpack.c.bf16 %v118_v8, %v117_v7  ;;  %v309_v12 = vpack.c.bf16 %v120_v11, %v119_v9  ;;  %v121_v13 = vld [vmem:[%s417_s3 + $0x20] sm:$0xff]  ;;  %v122_v14 = vld [vmem:[%s417_s3 + $0x28] sm:$0xff]  ;;  %v123_v17 = vld [vmem:[%s417_s3 + $0x30] sm:$0xff]  ;;  %vm216_vm2 = vcmp.lt.s32.totalorder %v215_v28, 16 }
   0x5   :  { %300 = vmatpush3.bf16.msra.mxu0 %v297_v3  ;;  %v313_v15 = vpack.c.bf16 %v122_v14, %v121_v13  ;;  %v21_v16 = vld [vmem:[%s416_s0 + $0x8] sm:$0xff]  ;;  %v124_v18 = vld [vmem:[%s417_s3 + $0x38] sm:$0xff]  ;;  %v245_v20 = vld [vmem:[%s418_s2] ss:$0 sm:$0xff] }
   0x6   :  { %302 = vmatprep.subr.bf16.mxu0 %v301_v6  ;;  %306 = vmatprep.subr.bf16.mxu1 %v305_v10  ;;  %v317_v19 = vpack.c.bf16 %v124_v18, %v123_v17  ;;  %v248_v29 = vld [vmem:[%s419_s4] ss:$0 sm:$0xff] }
   0x7   :  { %308 = vmatpush3.bf16.msra.mxu1 %v305_v10 }
   0x8   :  { %310 = vmatprep.subr.bf16.mxu1 %v309_v12 }
   0x9   :  { %304 = vmatpush3.bf16.msra.mxu0 %v301_v6 }
   0xb   :  { %312 = vmatpush3.bf16.msra.mxu1 %v309_v12 }
   0xc   :  { %276 = vmatmul.mubr.msk.f32.vlgmr.msra.gmra.mrb[0].mxu0 %vm33_vm0, %v21_v16  ;;  %314 = vmatprep.subr.bf16.mxu1 %v313_v15 }
   0xf   :  { %316 = vmatpush3.bf16.msra.mxu1 %v313_v15 }
  0x10   :  { %318 = vmatprep.subr.bf16.mxu1 %v317_v19 }
  0x13   :  { %320 = vmatpush3.bf16.msra.mxu1 %v317_v19 }
  0xdf   :  { %v277_v21 = vpop.f32.mrb[0].mxu0 }
  0xe0   :  { %v112_v22 = vadd.f32 %v277_v21, %v245_v20  ;;  %v106_v23 = vpop.f32.mrb[1].mxu0 }
  0xe1   :  { %v107_v24 = vadd.f32 %v245_v20, %v106_v23 }
  0xe2   :  { %v116_v26 = vmax.f32 %v112_v22, 0.0 }
  0xe3   :  { %v115_v25 = vmax.f32 %v107_v24, 0.0 }
  0xe5   :  { %294 = vmatprep.mubr.msk.f32.mxu1 %vm132_vm1, %v115_v25 }
  0xe6   :  { %295 = vmatmul.mubr.msk.f32.vlgmr.msra.gmra.mrb[0].mxu1 %vm132_vm1, %v116_v26 }
 0x1b9   :  { %v296_v30 = vpop.f32.mrb[0].mxu1 }
 0x1ba   :  { %v205_v31 = vpop.f32.mrb[1].mxu1  ;;  %v211_v33 = vadd.f32 %v296_v30, %v248_v29 }
 0x1bb   :  { %v206_v32 = vadd.f32 %v248_v29, %v205_v31 }
 0x1bc   :  { %v218_v35 = vsel %vm216_vm2, %v211_v33, -1e+30 }
 0x1bd   :  { %v217_v34 = vsel %vm216_vm2, %v206_v32, -1e+30 }
 0x1be   :  { %219 = vmax.xlane.f32.xlu0 %v217_v34 }
 0x1c2   :  { %221 = vmax.xlane.f32.xlu0 %v218_v35 }
 0x24b   :  { %v220_v36 = vpop.xlane.xlu0 %219 }
 0x24c   :  { %v223_v37 = vsub.f32 %v217_v34, %v220_v36 }
 0x24e   :  { %v225_v38 = vmul.f32 1.442695, %v223_v37 }
 0x24f   :  { %v222_v39 = vpop.xlane.xlu0 %221 }
 0x250   :  { %v224_v40 = vsub.f32 %v218_v35, %v222_v39  ;;  %321 = vpow2.f32 %v225_v38 }
 0x252   :  { %v227_v41 = vmul.f32 1.442695, %v224_v40 }
 0x254   :  { %323 = vpow2.f32 %v227_v41 }
 0x25a   :  { %v322_v42 = vpop.eup %321 }
 0x25b   :  { %229 = vadd.xlane.f32.xlu1 %v322_v42 }
 0x25e   :  { %v324_v43 = vpop.eup %323 }
 0x25f   :  { %231 = vadd.xlane.f32.xlu1 %v324_v43 }
 0x2e8   :  { %v230_v44 = vpop.xlane.xlu1 %229 }
 0x2e9   :  { %325 = vlog2.f32 %v230_v44 }
 0x2ec   :  { %v232_v45 = vpop.xlane.xlu1 %231 }
 0x2ed   :  { %327 = vlog2.f32 %v232_v45 }
 0x2f3   :  { %v326_v46 = vpop.eup %325 }
 0x2f4   :  { %v234_v47 = vmul.f32 0.6931472, %v326_v46 }
 0x2f6   :  { %v237_v48 = vsub.f32 %v223_v37, %v234_v47 }
 0x2f7   :  { %v328_v49 = vpop.eup %327 }
 0x2f8   :  { %239 = vst [vmem:[%s420_s5] sm:$0xff] %v237_v48  ;;  %v236_v50 = vmul.f32 0.6931472, %v328_v49 }
 0x2fa   :  { %v238_v51 = vsub.f32 %v224_v40, %v236_v50 }
 0x2fc   :  { %240 = vst [vmem:[%s420_s5 + $0x8] sm:$0xff] %v238_v51 }

// kernel: _mlp_log_softmax_impl.1
= control target key start
LH: loop header
LB: loop body
LE: loop exit
PB: predicated region body
PF: predicated region fallthrough
CT: control target
= control target key end

     0   :  { %vm33_vm0 = vcmask 261120   ;;  %vm132_vm1 = vcmask 523264   ;;  %v214_v27 = vlaneseq  ;;  %s415_s1 = inlined_call_operand.vmem [shape: f32[32,64], index: 1, kind: input, shape index: {}]   ;;  %s416_s0 = inlined_call_operand.vmem [shape: f32[16,32], index: 0, kind: input, shape index: {}]   ;;  %s417_s3 = inlined_call_operand.vmem [shape: f32[64,128], index: 3, kind: input, shape index: {}]   ;;  %s418_s2 = inlined_call_operand.vmem [shape: f32[1,64], index: 2, kind: input, shape index: {}]   ;;  %s419_s4 = inlined_call_operand.vmem [shape: f32[1,128], index: 4, kind: input, shape index: {}]   ;;  %s420_s5 = inlined_call_operand.vmem [shape: f32[16,128], index: 5, kind: output, shape index: {}]  }
   0x1   :  { %v22_v0 = vld [vmem:[%s415_s1] sm:$0xff]  ;;  %v23_v1 = vld [vmem:[%s415_s1 + $0x8] sm:$0xff]  ;;  %v24_v2 = vld [vmem:[%s415_s1 + $0x10] sm:$0xff] }
   0x2   :  { %v297_v3 = vpack.c.bf16 %v23_v1, %v22_v0  ;;  %v25_v4 = vld [vmem:[%s415_s1 + $0x18] sm:$0xff]  ;;  %v20_v5 = vld [vmem:[%s416_s0] sm:$0xff]  ;;  %v118_v8 = vld [vmem:[%s417_s3 + $0x8] sm:$0xff]  ;;  %v215_v28 = vand.u32 127, %v214_v27 }
   0x3   :  { %v301_v6 = vpack.c.bf16 %v25_v4, %v24_v2  ;;  %275 = vmatprep.mubr.msk.f32.mxu0 %vm33_vm0, %v20_v5  ;;  %v117_v7 = vld [vmem:[%s417_s3] sm:$0xff]  ;;  %v119_v9 = vld [vmem:[%s417_s3 + $0x10] sm:$0xff]  ;;  %v120_v11 = vld [vmem:[%s417_s3 + $0x18] sm:$0xff] }
   0x4   :  { %298 = vmatprep.subr.bf16.mxu0 %v297_v3  ;;  %v305_v10 = vpack.c.bf16 %v118_v8, %v117_v7  ;;  %v309_v12 = vpack.c.bf16 %v120_v11, %v119_v9  ;;  %v121_v13 = vld [vmem:[%s417_s3 + $0x20] sm:$0xff]  ;;  %v122_v14 = vld [vmem:[%s417_s3 + $0x28] sm:$0xff]  ;;  %v123_v17 = vld [vmem:[%s417_s3 + $0x30] sm:$0xff]  ;;  %vm216_vm2 = vcmp.lt.s32.totalorder %v215_v28, 16 }
   0x5   :  { %300 = vmatpush3.bf16.msra.mxu0 %v297_v3  ;;  %v313_v15 = vpack.c.bf16 %v122_v14, %v121_v13  ;;  %v21_v16 = vld [vmem:[%s416_s0 + $0x8] sm:$0xff]  ;;  %v124_v18 = vld [vmem:[%s417_s3 + $0x38] sm:$0xff]  ;;  %v245_v20 = vld [vmem:[%s418_s2] ss:$0 sm:$0xff] }
   0x6   :  { %302 = vmatprep.subr.bf16.mxu0 %v301_v6  ;;  %306 = vmatprep.subr.bf16.mxu1 %v305_v10  ;;  %v317_v19 = vpack.c.bf16 %v124_v18, %v123_v17  ;;  %v248_v29 = vld [vmem:[%s419_s4] ss:$0 sm:$0xff] }
   0x7   :  { %308 = vmatpush3.bf16.msra.mxu1 %v305_v10 }
   0x8   :  { %310 = vmatprep.subr.bf16.mxu1 %v309_v12 }
   0x9   :  { %304 = vmatpush3.bf16.msra.mxu0 %v301_v6 }
   0xb   :  { %312 = vmatpush3.bf16.msra.mxu1 %v309_v12 }
   0xc   :  { %276 = vmatmul.mubr.msk.f32.vlgmr.msra.gmra.mrb[0].mxu0 %vm33_vm0, %v21_v16  ;;  %314 = vmatprep.subr.bf16.mxu1 %v313_v15 }
   0xf   :  { %316 = vmatpush3.bf16.msra.mxu1 %v313_v15 }
  0x10   :  { %318 = vmatprep.subr.bf16.mxu1 %v317_v19 }
  0x13   :  { %320 = vmatpush3.bf16.msra.mxu1 %v317_v19 }
  0xdf   :  { %v277_v21 = vpop.f32.mrb[0].mxu0 }
  0xe0   :  { %v112_v22 = vadd.f32 %v277_v21, %v245_v20  ;;  %v106_v23 = vpop.f32.mrb[1].mxu0 }
  0xe1   :  { %v107_v24 = vadd.f32 %v245_v20, %v106_v23 }
  0xe2   :  { %v116_v26 = vmax.f32 %v112_v22, 0.0 }
  0xe3   :  { %v115_v25 = vmax.f32 %v107_v24, 0.0 }
  0xe5   :  { %294 = vmatprep.mubr.msk.f32.mxu1 %vm132_vm1, %v115_v25 }
  0xe6   :  { %295 = vmatmul.mubr.msk.f32.vlgmr.msra.gmra.mrb[0].mxu1 %vm132_vm1, %v116_v26 }
 0x1b9   :  { %v296_v30 = vpop.f32.mrb[0].mxu1 }
 0x1ba   :  { %v205_v31 = vpop.f32.mrb[1].mxu1  ;;  %v211_v33 = vadd.f32 %v296_v30, %v248_v29 }
 0x1bb   :  { %v206_v32 = vadd.f32 %v248_v29, %v205_v31 }
 0x1bc   :  { %v218_v35 = vsel %vm216_vm2, %v211_v33, -1e+30 }
 0x1bd   :  { %v217_v34 = vsel %vm216_vm2, %v206_v32, -1e+30 }
 0x1be   :  { %219 = vmax.xlane.f32.xlu0 %v217_v34 }
 0x1c2   :  { %221 = vmax.xlane.f32.xlu0 %v218_v35 }
 0x24b   :  { %v220_v36 = vpop.xlane.xlu0 %219 }
 0x24c   :  { %v223_v37 = vsub.f32 %v217_v34, %v220_v36 }
 0x24e   :  { %v225_v38 = vmul.f32 1.442695, %v223_v37 }
 0x24f   :  { %v222_v39 = vpop.xlane.xlu0 %221 }
 0x250   :  { %v224_v40 = vsub.f32 %v218_v35, %v222_v39  ;;  %321 = vpow2.f32 %v225_v38 }
 0x252   :  { %v227_v41 = vmul.f32 1.442695, %v224_v40 }
 0x254   :  { %323 = vpow2.f32 %v227_v41 }
 0x25a   :  { %v322_v42 = vpop.eup %321 }
 0x25b   :  { %229 = vadd.xlane.f32.xlu1 %v322_v42 }
 0x25e   :  { %v324_v43 = vpop.eup %323 }
 0x25f   :  { %231 = vadd.xlane.f32.xlu1 %v324_v43 }
 0x2e8   :  { %v230_v44 = vpop.xlane.xlu1 %229 }
 0x2e9   :  { %325 = vlog2.f32 %v230_v44 }
 0x2ec   :  { %v232_v45 = vpop.xlane.xlu1 %231 }
 0x2ed   :  { %327 = vlog2.f32 %v232_v45 }
 0x2f3   :  { %v326_v46 = vpop.eup %325 }
 0x2f4   :  { %v234_v47 = vmul.f32 0.6931472, %v326_v46 }
 0x2f6   :  { %v237_v48 = vsub.f32 %v223_v37, %v234_v47 }
 0x2f7   :  { %v328_v49 = vpop.eup %327 }
 0x2f8   :  { %239 = vst [vmem:[%s420_s5] sm:$0xff] %v237_v48  ;;  %v236_v50 = vmul.f32 0.6931472, %v328_v49 }
 0x2fa   :  { %v238_v51 = vsub.f32 %v224_v40, %v236_v50 }
 0x2fc   :  { %240 = vst [vmem:[%s420_s5 + $0x8] sm:$0xff] %v238_v51 }

</bundles_post_ra>
